<compile_context>
chip_gen: v5e
topology: v5e:2x2
jax: 0.10.0
libtpu: 0.0.40
codegen_flags: <defaults>
</compile_context>

<pallas_src>
import math

import jax
import jax.numpy as jnp
from jax import lax
from jax.experimental import pallas as pl
from jax.experimental.pallas import tpu as pltpu


def _round_up(a, b):
    return ((a + b - 1) // b) * b


def _tied_spline_linear_kernel(x_ref, w_ref, b_ref, o_ref):
    # x_ref: (TM, Kp)  flattened activations, Kp = round_up(in_features*(degree+1), 128)
    # w_ref: (Kp, O)   combined weight  W_spline[i, d] * W_lin[o, i]
    # b_ref: (1,  O)   linear bias, f32
    # o_ref: (TM, O)   narrow output tile (O == full output width)
    acc = jnp.dot(x_ref[...], w_ref[...],
                  preferred_element_type=jnp.float32,
                  precision=lax.Precision.HIGHEST)
    o_ref[...] = (acc + b_ref[...]).astype(o_ref.dtype)


def _tpu_vmem_capacity_bytes():
    try:
        return int(pltpu.get_tpu_info().vmem_capacity_bytes)
    except Exception:
        return 64 * 1024 * 1024   # conservative (v7x per-TC VMEM)


def _tpu_num_tensorcores():
    try:
        info = pltpu.get_tpu_info()
    except Exception:
        return 1
    for attr in ("num_cores", "num_tensorcores", "tensorcores_per_chip",
                 "cores_per_chip"):
        v = getattr(info, attr, None)
        if isinstance(v, int) and v > 0:
            return v
    return 1


def _choose_tile(M, tm_max, num_cores):
    """Row tile: as large as possible.  Split the grid only on multi-TC chips
    (v7x) and only when every per-core slab stays >= 512 rows."""
    m8 = _round_up(max(M, 1), 8)
    tm = min(tm_max, m8)
    if num_cores >= 2 and m8 >= num_cores * 512:
        per_core = _round_up(pl.cdiv(m8, num_cores), 8)
        tm = min(tm, max(per_core, 512))
    return max(tm, 8)


def tied_input_spline_linear_fast(x, spline_weight, linear_weight,
                                  linear_bias=None, *, tm_max=2048):
    """Forward pass of tied_input_SplineLinear_FAST.

    x:             (B, H, in_features, degree+1)  or  (H, in_features, degree+1)
    spline_weight: (in_features, degree+1)
    linear_weight: (out_features, in_features)
    linear_bias:   (out_features,) or None
    returns (B, H, out_features) or (H, out_features)
    """
    squeeze = (x.ndim == 3)
    if squeeze:
        x = x[None]
    B, H, I, Dp1 = x.shape
    O = linear_weight.shape[0]
    K = I * Dp1
    M = B * H

    # --- parameter glue: combined dense (K, O) weight ---------------------
    # Wc[(i, d), o] = W_spline[i, d] * W_lin[o, i]
    wc = (spline_weight[:, :, None] * linear_weight.T[:, None, :]).reshape(K, O)
    if linear_bias is None:
        bias = jnp.zeros((O,), dtype=jnp.float32)
    else:
        bias = linear_bias.astype(jnp.float32)
    bias = bias.reshape(1, O)

    xm = x.reshape(M, K)                 # contiguous reshape: free

    # Lane-align the contraction dim only when needed (K=128 in the example).
    Kp = _round_up(K, 128)
    if Kp != K:
        xm = jnp.pad(xm, ((0, 0), (0, Kp - K)))
        wc = jnp.pad(wc, ((0, Kp - K), (0, 0)))
    wc = wc.astype(x.dtype)

    # --- tiling ------------------------------------------------------------
    num_cores = _tpu_num_tensorcores()
    tm = _choose_tile(M, tm_max, num_cores)
    grid = (pl.cdiv(M, tm),)             # ragged final block is masked by Pallas

    itemsize = jnp.dtype(x.dtype).itemsize
    # Double-buffered x / weight / bias / output blocks (Pallas default).
    need = 2 * (tm * Kp * itemsize + Kp * O * itemsize + O * 4 + tm * O * itemsize)
    vmem_cap = _tpu_vmem_capacity_bytes()
    vmem_limit = int(min(0.75 * vmem_cap, max(need + (4 << 20), 16 << 20)))

    cost = pl.CostEstimate(
        flops=2 * M * Kp * O,
        transcendentals=0,
        bytes_accessed=(M * Kp * itemsize + Kp * O * itemsize
                        + M * O * itemsize + O * 4),
    )

    out = pl.pallas_call(
        _tied_spline_linear_kernel,
        out_shape=jax.ShapeDtypeStruct((M, O), x.dtype),
        grid_spec=pltpu.PrefetchScalarGridSpec(
            num_scalar_prefetch=0,
            grid=grid,
            in_specs=[
                pl.BlockSpec((tm, Kp), lambda i: (i, 0)),
                pl.BlockSpec((Kp, O), lambda i: (0, 0)),
                pl.BlockSpec((1, O), lambda i: (0, 0)),
            ],
            out_specs=pl.BlockSpec((tm, O), lambda i: (i, 0)),
        ),
        compiler_params=pltpu.CompilerParams(
            dimension_semantics=("parallel",),
            vmem_limit_bytes=vmem_limit,
        ),
        cost_estimate=cost,
    )(xm, wc, bias)

    out = out.reshape(B, H, O)           # contiguous reshape: free
    if squeeze:
        out = out[0]
    return out


def _reference(x, spline_weight, linear_weight, linear_bias):
    # Pure-JAX mirror of the PyTorch forward:
    #   x = (x * self.weight).sum(dim=-1); x = self.weighted_sum(x)
    s = (x * spline_weight).sum(axis=-1)                     # (..., I)
    y = jnp.dot(s, linear_weight.T, precision=lax.Precision.HIGHEST)
    return y + linear_bias                                   # (..., O)


def _trunc_normal(key, shape, std):
    # matches torch.nn.init.trunc_normal_(mean=0, std=std) truncated at +/-2 std
    return jax.random.truncated_normal(key, -2.0, 2.0, shape, jnp.float32) * std


if __name__ == "__main__":
    # Module config (small, consistent with the forward):
    in_features = 32
    out_features = 16
    degree = 3
    init_scale = 0.1

    B, H = 2, 8   # x: (batch, seq, in_features, degree+1)

    key = jax.random.PRNGKey(0)
    k_w, k_lw, k_lb, k_x = jax.random.split(key, 4)

    spline_weight = _trunc_normal(k_w, (in_features, degree + 1), init_scale)
    bound = 1.0 / math.sqrt(in_features)   # nn.Linear default init range
    linear_weight = jax.random.uniform(k_lw, (out_features, in_features),
                                       jnp.float32, -bound, bound)
    linear_bias = jax.random.uniform(k_lb, (out_features,),
                                     jnp.float32, -bound, bound)

    x = jax.random.normal(k_x, (B, H, in_features, degree + 1), jnp.float32)

    out = tied_input_spline_linear_fast(x, spline_weight, linear_weight,
                                        linear_bias)
    out = jax.block_until_ready(out)

    ref = _reference(x, spline_weight, linear_weight, linear_bias)
    assert out.shape == (B, H, out_features)
    assert jnp.allclose(out, ref, atol=1e-4, rtol=1e-3), "mismatch vs reference"

    print("KERNEL_OK")
</pallas_src>

<mosaic_0001>
module attributes {stable_mosaic.version = 11 : i64} {
  func.func @_tied_spline_linear_kernel(%arg0: i32, %arg1: memref<16x128xf32, #tpu.memory_space<vmem>>, %arg2: memref<128x16xf32, #tpu.memory_space<vmem>>, %arg3: memref<1x16xf32, #tpu.memory_space<vmem>>, %arg4: memref<16x16xf32, #tpu.memory_space<vmem>>) attributes {dimension_semantics = [#tpu.dimension_semantics<parallel>], iteration_bounds = array<i64: 1>, scalar_prefetch = 0 : i64, scratch_operands = 0 : i64, tpu.core_type = #tpu.core_type<tc>, window_params = [{transform_indices = @transform_0, window_bounds = array<i64: 16, 128>}, {pipeline_mode = #tpu.pipeline_mode<synchronous>, transform_indices = @transform_1, window_bounds = array<i64: 128, 16>}, {pipeline_mode = #tpu.pipeline_mode<synchronous>, transform_indices = @transform_2, window_bounds = array<i64: 1, 16>}, {transform_indices = @transform_3, window_bounds = array<i64: 16, 16>}]} {
    %c0 = arith.constant 0 : index
    %c0_0 = arith.constant 0 : index
    %0 = vector.load %arg1[%c0, %c0_0] : memref<16x128xf32, #tpu.memory_space<vmem>>, vector<16x128xf32>
    %c0_1 = arith.constant 0 : index
    %c0_2 = arith.constant 0 : index
    %1 = vector.load %arg2[%c0_1, %c0_2] : memref<128x16xf32, #tpu.memory_space<vmem>>, vector<128x16xf32>
    %cst = arith.constant dense<0.000000e+00> : vector<16x16xf32>
    %2 = tpu.matmul %0, %1, %cst {dimension_numbers = #tpu.dot_dimension_numbers<[1], [0], [0], [1], [0, 0, 1, 1], [], []>, precision = #tpu.contract_precision<fp32>} : vector<16x128xf32>, vector<128x16xf32>, vector<16x16xf32> -> vector<16x16xf32>
    %c0_3 = arith.constant 0 : index
    %c0_4 = arith.constant 0 : index
    %3 = vector.load %arg3[%c0_3, %c0_4] : memref<1x16xf32, #tpu.memory_space<vmem>>, vector<1x16xf32>
    %4 = vector.broadcast %3 : vector<1x16xf32> to vector<16x16xf32>
    %5 = arith.addf %2, %4 : vector<16x16xf32>
    %c0_5 = arith.constant 0 : index
    %c0_6 = arith.constant 0 : index
    %6 = vector.load %arg4[%c0_5, %c0_6] : memref<16x16xf32, #tpu.memory_space<vmem>>, vector<16x16xf32>
    tpu.vector_store %arg4[%c0_5, %c0_6], %5 {strides = array<i32>} : memref<16x16xf32, #tpu.memory_space<vmem>>, vector<16x16xf32>,
    return
  }
  func.func @transform_0(%arg0: i32) -> (i32, i32) {
    %c0_i32 = arith.constant 0 : i32
    %c0_i32_0 = arith.constant 0 : i32
    return %arg0, %c0_i32 : i32, i32
  }
  func.func @transform_1(%arg0: i32) -> (i32, i32) {
    %c0_i32 = arith.constant 0 : i32
    %c0_i32_0 = arith.constant 0 : i32
    %c0_i32_1 = arith.constant 0 : i32
    return %c0_i32, %c0_i32_0 : i32, i32
  }
  func.func @transform_2(%arg0: i32) -> (i32, i32) {
    %c0_i32 = arith.constant 0 : i32
    %c0_i32_0 = arith.constant 0 : i32
    %c0_i32_1 = arith.constant 0 : i32
    return %c0_i32, %c0_i32_0 : i32, i32
  }
  func.func @transform_3(%arg0: i32) -> (i32, i32) {
    %c0_i32 = arith.constant 0 : i32
    %c0_i32_0 = arith.constant 0 : i32
    return %arg0, %c0_i32 : i32, i32
  }
}

</mosaic_0001>

<bundles_post_ra>
// kernel: tpu_custom_call.1
= control target key start
LH: loop header
LB: loop body
LE: loop exit
PB: predicated region body
PF: predicated region fallthrough
CT: control target
= control target key end

     0   :  { %s779_s0 = inlined_call_operand.vmem [shape: f32[16,128], index: 0, kind: input, shape index: {}]   ;;  %s780_s1 = inlined_call_operand.vmem [shape: f32[128,16], index: 1, kind: input, shape index: {}]   ;;  %s781_s2 = inlined_call_operand.vmem [shape: f32[1,16], index: 2, kind: input, shape index: {}]   ;;  %s782_s3 = inlined_call_operand.hbm [shape: f32[16,16], index: 3, kind: output, shape index: {}]  }
   0x1   :  { %v32_v0 = vld [vmem:[%s780_s1 + $0x78] sm:$0xff]  ;;  %v31_v1 = vld [vmem:[%s780_s1 + $0x70] sm:$0xff]  ;;  %v30_v2 = vld [vmem:[%s780_s1 + $0x68] sm:$0xff] }
   0x2   :  { %v524_v3 = vand.u32 4294901760, %v32_v0  ;;  %v526_v4 = vand.u32 4294901760, %v31_v1  ;;  %v528_v5 = vand.u32 4294901760, %v30_v2  ;;  %v29_v6 = vld [vmem:[%s780_s1 + $0x60] sm:$0xff]  ;;  %v28_v7 = vld [vmem:[%s780_s1 + $0x58] sm:$0xff]  ;;  %v27_v8 = vld [vmem:[%s780_s1 + $0x50] sm:$0xff] }
   0x3   :  { %v539_v9 = vand.u32 4294901760, %v29_v6  ;;  %v541_v10 = vand.u32 4294901760, %v28_v7  ;;  %v543_v11 = vand.u32 4294901760, %v27_v8  ;;  %v26_v12 = vld [vmem:[%s780_s1 + $0x48] sm:$0xff]  ;;  %v25_v13 = vld [vmem:[%s780_s1 + $0x40] sm:$0xff]  ;;  %v24_v18 = vld [vmem:[%s780_s1 + $0x38] sm:$0xff] }
   0x4   :  { %38 = vmatpush.msra.mxu0 %v524_v3  ;;  %v87_v14 = vsub.f32 %v32_v0, %v524_v3  ;;  %v93_v15 = vsub.f32 %v31_v1, %v526_v4  ;;  %251 = vmatpush.msra.mxu3 %v524_v3  ;;  %v99_v16 = vsub.f32 %v30_v2, %v528_v5  ;;  %v556_v17 = vand.u32 4294901760, %v26_v12  ;;  %v23_v26 = vld [vmem:[%s780_s1 + $0x30] sm:$0xff] }
   0x5   :  { %v105_v19 = vsub.f32 %v29_v6, %v539_v9  ;;  %v111_v20 = vsub.f32 %v28_v7, %v541_v10  ;;  %v563_v21 = vand.u32 4294901760, %v25_v13  ;;  %v117_v25 = vsub.f32 %v27_v8, %v543_v11 }
   0x6   :  { %40 = vmatpush.msra.mxu0 %v526_v4  ;;  %193 = vmatpush.msra.mxu2 %v87_v14  ;;  %v566_v22 = vand.u32 4294901760, %v87_v14  ;;  %v568_v23 = vand.u32 4294901760, %v93_v15  ;;  %v570_v24 = vand.u32 4294901760, %v99_v16  ;;  %v123_v28 = vsub.f32 %v26_v12, %v556_v17 }
   0x7   :  { %253 = vmatpush.msra.mxu3 %v526_v4  ;;  %v577_v27 = vand.u32 4294901760, %v105_v19  ;;  %v580_v29 = vand.u32 4294901760, %v24_v18 }
   0x8   :  { %8 = vsyncpa [#allocation3], 0  ;;  %42 = vmatpush.msra.mxu0 %v528_v5  ;;  %196 = vmatpush.msra.mxu2 %v93_v15  ;;  %v89_v30 = vsub.f32 %v87_v14, %v566_v22  ;;  %v95_v31 = vsub.f32 %v93_v15, %v568_v23  ;;  %v101_v32 = vsub.f32 %v99_v16, %v570_v24  ;;  %v586_v33 = vand.u32 4294901760, %v111_v20  ;;  %v22_v36 = vld [vmem:[%s780_s1 + $0x28] sm:$0xff]  ;;  %v21_v42 = vld [vmem:[%s780_s1 + $0x20] sm:$0xff]  ;;  %s492_s21 = smov [#allocation2]  }
   0x9   :  { %255 = vmatpush.msra.mxu3 %v528_v5  ;;  %v129_v34 = vsub.f32 %v25_v13, %v563_v21  ;;  %v590_v35 = vand.u32 4294901760, %v23_v26  ;;  %v107_v39 = vsub.f32 %v105_v19, %v577_v27  ;;  %v597_v40 = vand.u32 4294901760, %v117_v25  ;;  %v20_v48 = vld [vmem:[%s780_s1 + $0x18] sm:$0xff]  ;;  %v19_v54 = vld [vmem:[%s780_s1 + $0x10] sm:$0xff]  ;;  %v18_v60 = vld [vmem:[%s780_s1 + $0x8] sm:$0xff]  ;;  %s416_s22 = sshll.u32 %s492_s21, 4  ;;  %s417_s22 = int_to_ptr.vmem [resolvable:$true] %s416_s22 }
   0xa   :  { %44 = vmatpush.msra.mxu0 %v539_v9  ;;  %199 = vmatpush.msra.mxu2 %v99_v16  ;;  %v90_v37 = vand.u32 4294901760, %v89_v30  ;;  %v96_v38 = vand.u32 4294901760, %v95_v31  ;;  %v600_v41 = vand.u32 4294901760, %v123_v28  ;;  %v102_v43 = vand.u32 4294901760, %v101_v32  ;;  %v17_v2 = vld [vmem:[%s780_s1] sm:$0xff]  ;;  %s493_s25 = smov 128  }
   0xb   :  { %257 = vmatpush.msra.mxu3 %v539_v9  ;;  %v113_v44 = vsub.f32 %v111_v20, %v586_v33  ;;  %v135_v45 = vsub.f32 %v24_v18, %v580_v29  ;;  %v608_v46 = vand.u32 4294901760, %v22_v36  ;;  %v611_v47 = vand.u32 4294901760, %v129_v34  ;;  %s494_s26 = smov 8  }
   0xc   :  { %46 = vmatpush.msra.mxu0 %v541_v10  ;;  %91 = vmatpush.msra.mxu1 %v90_v37  ;;  %v108_v49 = vand.u32 4294901760, %v107_v39  ;;  %v119_v50 = vsub.f32 %v117_v25, %v597_v40  ;;  %v141_v51 = vsub.f32 %v23_v26, %v590_v35  ;;  %v619_v52 = vand.u32 4294901760, %v21_v42 }
   0xd   :  { %202 = vmatpush.msra.mxu2 %v105_v19  ;;  %259 = vmatpush.msra.mxu3 %v541_v10  ;;  %v125_v53 = vsub.f32 %v123_v28, %v600_v41  ;;  %v114_v55 = vand.u32 4294901760, %v113_v44  ;;  %v147_v56 = vsub.f32 %v22_v36, %v608_v46  ;;  %v628_v57 = vand.u32 4294901760, %v20_v48 }
   0xe   :  { %48 = vmatpush.msra.mxu0 %v543_v11  ;;  %97 = vmatpush.msra.mxu1 %v96_v38  ;;  %v630_v58 = vand.u32 4294901760, %v135_v45  ;;  %v131_v59 = vsub.f32 %v129_v34, %v611_v47  ;;  %v120_v61 = vand.u32 4294901760, %v119_v50  ;;  %v153_v62 = vsub.f32 %v21_v42, %v619_v52  ;;  %v15_v38 = vld [vmem:[%s779_s0] sm:$0xff] }
   0xf   :  { %205 = vmatpush.msra.mxu2 %v111_v20  ;;  %261 = vmatpush.msra.mxu3 %v543_v11  ;;  %v639_v63 = vand.u32 4294901760, %v19_v54  ;;  %v641_v0 = vand.u32 4294901760, %v141_v51  ;;  %v126_v1 = vand.u32 4294901760, %v125_v53  ;;  %v159_v7 = vsub.f32 %v20_v48, %v628_v57 }
  0x10   :  { %50 = vmatpush.msra.mxu0 %v556_v17  ;;  %103 = vmatpush.msra.mxu1 %v102_v43  ;;  %v137_v6 = vsub.f32 %v135_v45, %v630_v58  ;;  %v650_v8 = vand.u32 4294901760, %v18_v60  ;;  %v652_v12 = vand.u32 4294901760, %v147_v56  ;;  %v132_v13 = vand.u32 4294901760, %v131_v59 }
  0x11   :  { %208 = vmatpush.msra.mxu2 %v117_v25  ;;  %263 = vmatpush.msra.mxu3 %v556_v17  ;;  %v143_v14 = vsub.f32 %v141_v51, %v641_v0  ;;  %v165_v15 = vsub.f32 %v19_v54, %v639_v63  ;;  %v658_v16 = vand.u32 4294901760, %v17_v2  ;;  %v660_v18 = vand.u32 4294901760, %v153_v62 }
  0x12   :  { %52 = vmatpush.msra.mxu0 %v563_v21  ;;  %109 = vmatpush.msra.mxu1 %v108_v49  ;;  %v138_v19 = vand.u32 4294901760, %v137_v6  ;;  %v149_v20 = vsub.f32 %v147_v56, %v652_v12  ;;  %v171_v25 = vsub.f32 %v18_v60, %v650_v8  ;;  %v666_v26 = vand.u32 4294901760, %v159_v7 }
  0x13   :  { %211 = vmatpush.msra.mxu2 %v123_v28  ;;  %265 = vmatpush.msra.mxu3 %v563_v21  ;;  %v144_v28 = vand.u32 4294901760, %v143_v14  ;;  %v155_v30 = vsub.f32 %v153_v62, %v660_v18  ;;  %v177_v31 = vsub.f32 %v17_v2, %v658_v16  ;;  %v672_v32 = vand.u32 4294901760, %v165_v15 }
  0x14   :  { %54 = vmatpush.msra.mxu0 %v580_v29  ;;  %115 = vmatpush.msra.mxu1 %v114_v55  ;;  %v161_v36 = vsub.f32 %v159_v7, %v666_v26  ;;  %v677_v37 = vand.u32 4294901760, %v171_v25  ;;  %v688_v44 = vand.u32 4294901760, %v15_v38  ;;  %v16_v55 = vld [vmem:[%s779_s0 + $0x8] sm:$0xff]  ;;  %vm409_vm0 = vcmask 130048  }
  0x15   :  { %214 = vmatpush.msra.mxu2 %v129_v34  ;;  %267 = vmatpush.msra.mxu3 %v580_v29  ;;  %v150_v34 = vand.u32 4294901760, %v149_v20  ;;  %v156_v39 = vand.u32 4294901760, %v155_v30  ;;  %v167_v42 = vsub.f32 %v165_v15, %v672_v32  ;;  %v685_v43 = vand.u32 4294901760, %v177_v31 }
  0x16   :  { %56 = vmatpush.msra.mxu0 %v590_v35  ;;  %121 = vmatpush.msra.mxu1 %v120_v61  ;;  %v173_v48 = vsub.f32 %v171_v25, %v677_v37  ;;  %v708_v59 = vand.u32 4294901760, %v16_v55 }
  0x17   :  { %217 = vmatpush.msra.mxu2 %v135_v45  ;;  %269 = vmatpush.msra.mxu3 %v590_v35  ;;  %v162_v45 = vand.u32 4294901760, %v161_v36  ;;  %v168_v49 = vand.u32 4294901760, %v167_v42  ;;  %v179_v50 = vsub.f32 %v177_v31, %v685_v43 }
  0x18   :  { %58 = vmatpush.msra.mxu0 %v608_v46  ;;  %127 = vmatpush.msra.mxu1 %v126_v1  ;;  %v174_v53 = vand.u32 4294901760, %v173_v48 }
  0x19   :  { %220 = vmatpush.msra.mxu2 %v141_v51  ;;  %271 = vmatpush.msra.mxu3 %v608_v46  ;;  %v70_v51 = vsub.f32 %v15_v38, %v688_v44  ;;  %v180_v54 = vand.u32 4294901760, %v179_v50 }
  0x1a   :  { %60 = vmatpush.msra.mxu0 %v619_v52  ;;  %133 = vmatpush.msra.mxu1 %v132_v13 }
  0x1b   :  { %223 = vmatpush.msra.mxu2 %v147_v56  ;;  %273 = vmatpush.msra.mxu3 %v619_v52  ;;  %v71_v56 = vand.u32 4294901760, %v70_v51 }
  0x1c   :  { %62 = vmatpush.msra.mxu0 %v628_v57  ;;  %139 = vmatpush.msra.mxu1 %v138_v19 }
  0x1d   :  { %226 = vmatpush.msra.mxu2 %v153_v62  ;;  %275 = vmatpush.msra.mxu3 %v628_v57 }
  0x1e   :  { %64 = vmatpush.msra.mxu0 %v639_v63  ;;  %145 = vmatpush.msra.mxu1 %v144_v28 }
  0x1f   :  { %229 = vmatpush.msra.mxu2 %v159_v7  ;;  %277 = vmatpush.msra.mxu3 %v639_v63 }
  0x20   :  { %66 = vmatpush.msra.mxu0 %v650_v8  ;;  %151 = vmatpush.msra.mxu1 %v150_v34 }
  0x21   :  { %232 = vmatpush.msra.mxu2 %v165_v15  ;;  %279 = vmatpush.msra.mxu3 %v650_v8 }
  0x22   :  { %68 = vmatpush.msra.mxu0 %v658_v16  ;;  %157 = vmatpush.msra.mxu1 %v156_v39 }
  0x23   :  { %235 = vmatpush.msra.mxu2 %v171_v25  ;;  %281 = vmatpush.msra.mxu3 %v658_v16 }
  0x24   :  { %298 = vmatpush.msrb.mxu0 %v566_v22  ;;  %163 = vmatpush.msra.mxu1 %v162_v45 }
  0x25   :  { %238 = vmatpush.msra.mxu2 %v177_v31  ;;  %446 = vmatpush.msrb.mxu3 %v524_v3 }
  0x26   :  { %302 = vmatpush.msrb.mxu0 %v568_v23  ;;  %169 = vmatpush.msra.mxu1 %v168_v49 }
  0x27   :  { %430 = vmatpush.msrb.mxu2 %v566_v22  ;;  %447 = vmatpush.msrb.mxu3 %v526_v4  ;;  %v72_v22 = vsub.f32 %v70_v51, %v71_v56 }
  0x28   :  { %306 = vmatpush.msrb.mxu0 %v570_v24  ;;  %175 = vmatpush.msra.mxu1 %v174_v53 }
  0x29   :  { %431 = vmatpush.msrb.mxu2 %v568_v23  ;;  %448 = vmatpush.msrb.mxu3 %v528_v5  ;;  %v78_v23 = vsub.f32 %v16_v55, %v708_v59 }
  0x2a   :  { %310 = vmatpush.msrb.mxu0 %v577_v27  ;;  %181 = vmatpush.msra.mxu1 %v180_v54 }
  0x2b   :  { %432 = vmatpush.msrb.mxu2 %v570_v24  ;;  %449 = vmatpush.msrb.mxu3 %v539_v9 }
  0x2c   :  { %314 = vmatpush.msrb.mxu0 %v586_v33  ;;  %369 = vmatpush.msrb.mxu1 %v524_v3  ;;  %v73_v3 = vand.u32 4294901760, %v72_v22 }
  0x2d   :  { %433 = vmatpush.msrb.mxu2 %v577_v27  ;;  %450 = vmatpush.msrb.mxu3 %v541_v10 }
  0x2e   :  { %318 = vmatpush.msrb.mxu0 %v597_v40  ;;  %371 = vmatpush.msrb.mxu1 %v526_v4  ;;  %v79_v4 = vand.u32 4294901760, %v78_v23 }
  0x2f   :  { %434 = vmatpush.msrb.mxu2 %v586_v33  ;;  %451 = vmatpush.msrb.mxu3 %v543_v11 }
  0x30   :  { %322 = vmatpush.msrb.mxu0 %v600_v41  ;;  %373 = vmatpush.msrb.mxu1 %v528_v5  ;;  %v80_v5 = vsub.f32 %v78_v23, %v79_v4 }
  0x31   :  { %435 = vmatpush.msrb.mxu2 %v597_v40  ;;  %74 = vmatmul.f32.vlgmr.msra.gmra.mxu0 %v73_v3 }
  0x32   :  { %326 = vmatpush.msrb.mxu0 %v611_v47  ;;  %375 = vmatpush.msrb.mxu1 %v539_v9  ;;  %v81_v9 = vand.u32 4294901760, %v80_v5 }
  0x33   :  { %436 = vmatpush.msrb.mxu2 %v600_v41  ;;  %452 = vmatpush.msrb.mxu3 %v556_v17 }
  0x34   :  { %377 = vmatpush.msrb.mxu1 %v541_v10  ;;  %330 = vmatpush.msrb.mxu0 %v630_v58 }
  0x35   :  { %437 = vmatpush.msrb.mxu2 %v611_v47  ;;  %453 = vmatpush.msrb.mxu3 %v563_v21 }
  0x36   :  { %241 = vmatmul.f32.vlgmr.msra.gmra.mxu2 %v70_v51  ;;  %334 = vmatpush.msrb.mxu0 %v641_v0 }
  0x37   :  { %438 = vmatpush.msrb.mxu2 %v630_v58  ;;  %379 = vmatpush.msrb.mxu1 %v543_v11 }
  0x38   :  { %285 = vmatmul.f32.vlgmr.msra.gmra.mxu3 %v71_v56  ;;  %338 = vmatpush.msrb.mxu0 %v652_v12 }
  0x39   :  { %439 = vmatpush.msrb.mxu2 %v641_v0  ;;  %381 = vmatpush.msrb.mxu1 %v556_v17 }
  0x3a   :  { %454 = vmatpush.msrb.mxu3 %v580_v29  ;;  %183 = vmatmul.f32.vlgmr.msra.gmra.mxu1 %v688_v44 }
  0x3b   :  { %440 = vmatpush.msrb.mxu2 %v652_v12  ;;  %342 = vmatpush.msrb.mxu0 %v660_v18 }
  0x3c   :  { %383 = vmatpush.msrb.mxu1 %v563_v21  ;;  %455 = vmatpush.msrb.mxu3 %v590_v35  ;;  %v465_v21 = vld [vmem:[%s781_s2] ss:$0 sm:$0xff]  ;;  %s418_s2 = sshll.u32 %s782_s3, 4  ;;  %s419_s2 = int_to_ptr.hbm [resolvable:$true] %s418_s2 }
  0x3d   :  { %82 = vmatmul.f32.gmra.mxu0 %v81_v9  ;;  %441 = vmatpush.msrb.mxu2 %v660_v18 }
  0x3e   :  { %346 = vmatpush.msrb.mxu0 %v666_v26  ;;  %385 = vmatpush.msrb.mxu1 %v580_v29 }
  0x3f   :  { %456 = vmatpush.msrb.mxu3 %v608_v46  ;;  %246 = vmatmul.f32.gmra.mxu2 %v78_v23 }
  0x40   :  { %442 = vmatpush.msrb.mxu2 %v666_v26  ;;  %350 = vmatpush.msrb.mxu0 %v672_v32 }
  0x41   :  { %387 = vmatpush.msrb.mxu1 %v590_v35  ;;  %457 = vmatpush.msrb.mxu3 %v619_v52 }
  0x42   :  { %291 = vmatmul.f32.gmra.mxu3 %v79_v4  ;;  %443 = vmatpush.msrb.mxu2 %v672_v32 }
  0x43   :  { %354 = vmatpush.msrb.mxu0 %v677_v37  ;;  %389 = vmatpush.msrb.mxu1 %v608_v46 }
  0x44   :  { %458 = vmatpush.msrb.mxu3 %v628_v57  ;;  %187 = vmatmul.f32.gmra.mxu1 %v708_v59 }
  0x45   :  { %444 = vmatpush.msrb.mxu2 %v677_v37  ;;  %358 = vmatpush.msrb.mxu0 %v685_v43 }
  0x46   :  { %391 = vmatpush.msrb.mxu1 %v619_v52  ;;  %459 = vmatpush.msrb.mxu3 %v639_v63 }
  0x47   :  { %360 = vmatmul.f32.vlgmr.msrb.gmra.mxu0 %v688_v44  ;;  %445 = vmatpush.msrb.mxu2 %v685_v43 }
  0x48   :  { %393 = vmatpush.msrb.mxu1 %v628_v57  ;;  %460 = vmatpush.msrb.mxu3 %v650_v8 }
  0x49   :  { %364 = vmatmul.f32.vlgmr.msrb.gmra.mxu2 %v708_v59 }
  0x4a   :  { %395 = vmatpush.msrb.mxu1 %v639_v63  ;;  %461 = vmatpush.msrb.mxu3 %v658_v16 }
  0x4b   :  { %405 = vmatmul.f32.vlgmr.msrb.gmra.mxu3 %v708_v59 }
  0x4c   :  { %397 = vmatpush.msrb.mxu1 %v650_v8 }
  0x4e   :  { %399 = vmatpush.msrb.mxu1 %v658_v16 }
  0x4f   :  { %401 = vmatmul.f32.vlgmr.msrb.gmra.mxu1 %v688_v44 }
  0xae   :  { %v75_v10 = vpop.f32.mrf.mxu0 }
  0xaf   :  { %v76_v27 = vadd.f32 %v465_v21, %v75_v10 }
  0xb7   :  { %v184_v11 = vpop.f32.mrf.mxu1 }
  0xb8   :  { %v185_v35 = vadd.f32 %v184_v11, %v76_v27 }
  0xb9   :  { %v242_v17 = vpop.f32.mrf.mxu2 }
  0xba   :  { %v83_v29 = vpop.f32.mrf.mxu0  ;;  %v243_v47 = vadd.f32 %v242_v17, %v185_v35 }
  0xbb   :  { %v286_v24 = vpop.f32.mrf.mxu3  ;;  %v84_v33 = vadd.f32 %v465_v21, %v83_v29 }
  0xbc   :  { %v287_v60 = vadd.f32 %v286_v24, %v243_v47 }
  0xc1   :  { %v188_v40 = vpop.f32.mrf.mxu1 }
  0xc2   :  { %v247_v41 = vpop.f32.mrf.mxu2  ;;  %v189_v46 = vadd.f32 %v188_v40, %v84_v33 }
  0xc4   :  { %v248_v57 = vadd.f32 %v247_v41, %v189_v46  ;;  %v361_v58 = vpop.f32.mrf.mxu0 }
  0xc5   :  { %v292_v52 = vpop.f32.mrf.mxu3  ;;  %v362_v61 = vadd.f32 %v361_v58, %v287_v60 }
  0xc6   :  { %v293_v62 = vadd.f32 %v292_v52, %v248_v57 }
  0xcc   :  { %v365_v63 = vpop.f32.mrf.mxu2  ;;  %v402_v0 = vpop.f32.mrf.mxu1 }
  0xcd   :  { %v366_v1 = vadd.f32 %v365_v63, %v293_v62  ;;  %v403_v2 = vadd.f32 %v402_v0, %v362_v61 }
  0xce   :  { %v406_v6 = vpop.f32.mrf.mxu3 }
  0xcf   :  { %410 = vst.msk [vmem:[#allocation2] sm:$0xff] %vm409_vm0, %v403_v2  ;;  %v407_v7 = vadd.f32 %v406_v6, %v366_v1 }
  0xd1   :  { %411 = vst.msk [vmem:[#allocation2 + $0x8] sm:$0xff] %vm409_vm0, %v407_v7 }
  0xd2   :  { %424 = dma.vmem_to_hbm [thread:$0]  %s417_s22, 256, %s419_s2, [#allocation3], %s493_s25, %s493_s25, %s494_s26  }
  0xd3   :  { %490 = dma.done.wait [#allocation3], 256  }
  0xd4   :  { %491 = vsyncadd [#allocation3], 4294967040 }
  0xd5   :  { %429 = vsyncpa [#allocation3], 1 }

</bundles_post_ra>
